<compile_context>
chip_gen: v7x
topology: tpu7x:2x2x1
jax: 0.10.0
libtpu: 0.0.40
codegen_flags: <defaults>
</compile_context>

<pallas_src>
import functools

import jax
import jax.numpy as jnp
from jax import lax
from jax.experimental import pallas as pl
from jax.experimental.pallas import tpu as pltpu


def _round_up(x, m):
    return ((x + m - 1) // m) * m


# ---------------------------------------------------------------------------
# Kernel: one lane-dense batch tile of the pinball loss, accumulated per core
# ---------------------------------------------------------------------------
def _pinball_kernel(actual_ref, fc_ref, qpos_ref, qneg_ref, out_ref, acc_ref,
                    *, batch, tile_b, inner, need_mask):
    c = pl.program_id(0)          # core-split axis ("parallel", 2 TCs on v7x)
    i = pl.program_id(1)          # batch-block axis ("arbitrary", accumulated)

    @pl.when(i == 0)
    def _init():
        acc_ref[...] = jnp.zeros_like(acc_ref)

    a = actual_ref[...].astype(jnp.float32)      # (A, tile_b), A in {1, Q}
    f = fc_ref[...].astype(jnp.float32)          # (Q, tile_b)

    d = a - f                                    # (Q, tile_b) via sublane broadcast
    # pinball:  d*q (d>=0)  or  d*(q-1) (d<0)  == q*max(d,0) + (1-q)*max(-d,0)
    w = jnp.where(d >= 0.0, qpos_ref[...], qneg_ref[...])   # (Q,1) -> lanes
    contrib = d * w

    if need_mask:
        # Zero lanes whose global batch index is out of range (ragged tail of
        # the last block and fully-out-of-range duplicate blocks from the
        # core split).  Select drops any garbage/NaN from the uninit region.
        start = (c * inner + i) * tile_b
        lane = lax.broadcasted_iota(jnp.int32, contrib.shape, 1) + start
        contrib = jnp.where(lane < batch, contrib, 0.0)

    acc_ref[...] += contrib                      # plain VPU add, no per-step XLU

    @pl.when(i == pl.num_programs(1) - 1)
    def _finalize():
        total = jnp.sum(acc_ref[...])            # single XLU reduce per core
        out_ref[...] = jnp.broadcast_to(total, out_ref.shape)


# ---------------------------------------------------------------------------
# Wrapper mirroring torch Loss_pinball
# ---------------------------------------------------------------------------
class LossPinballPallas:
    def __init__(self, list_quantiles, dev=None):
        del dev  # device handled by JAX
        self.list_quantiles = list(list_quantiles)
        self.n_quantiles = len(self.list_quantiles)
        q = jnp.asarray(self.list_quantiles, dtype=jnp.float32).reshape(-1, 1)
        self._q_pos = q            # (Q, 1) weight where diff >= 0
        self._q_neg = q - 1.0      # (Q, 1) weight where diff <  0
        # NOTE: torch keeps the quantile tensor in float64 and promotes the
        # loss; on TPU everything stays f32 (hierarchical sum limits drift).

    def __call__(self, labels, fc_SI_quant, *, tile_b=16384):
        actual = labels[0] if isinstance(labels, (tuple, list)) else labels
        fc = fc_SI_quant

        if fc.ndim != 2:
            raise ValueError("fc_SI_quant must be [batch, n_quantiles]")
        B, Q = fc.shape
        assert Q == self.n_quantiles

        # Lane-dense layout plumbing: batch on the last (lane) axis.
        if actual.ndim == 1:
            assert actual.shape[0] == B
            actual_t = actual.reshape(1, B)                  # free view
        else:
            assert actual.shape[0] == B and actual.shape[1] in (1, Q)
            actual_t = actual.T                              # (A, B)
        A = actual_t.shape[0]
        fc_t = fc.T                                          # (Q, B)

        # Tile sizing: large lane tiles amortize the ~0.35us per-step overhead;
        # lane-dense blocks are only ~8*tile_b*4 bytes so VMEM is never tight.
        tile_b = max(128, (int(tile_b) // 128) * 128)
        tile_b = min(tile_b, _round_up(B, 128))

        nb = pl.cdiv(B, tile_b)                  # batch blocks (no padding)
        n_split = 2 if nb >= 2 else 1            # 2-way TC split on v7x
        inner = pl.cdiv(nb, n_split)
        need_mask = (B % tile_b != 0) or (n_split * inner != nb)

        def _blk(c, i):
            # Clamp overflow blocks of the core split to a valid block; the
            # in-kernel mask zeros their contribution.
            return jnp.minimum(c * inner + i, nb - 1)

        kernel = functools.partial(
            _pinball_kernel,
            batch=B, tile_b=tile_b, inner=inner, need_mask=need_mask)

        cost = pl.CostEstimate(
            flops=4 * B * Q,
            transcendentals=0,
            bytes_accessed=4 * (B * Q + B * A + 2 * Q + n_split * 8 * 128),
        )

        out = pl.pallas_call(
            kernel,
            out_shape=jax.ShapeDtypeStruct((n_split, 8, 128), jnp.float32),
            grid_spec=pltpu.PrefetchScalarGridSpec(
                num_scalar_prefetch=0,
                grid=(n_split, inner),
                in_specs=[
                    pl.BlockSpec((A, tile_b), lambda c, i: (0, _blk(c, i))),  # actual
                    pl.BlockSpec((Q, tile_b), lambda c, i: (0, _blk(c, i))),  # fc
                    pl.BlockSpec((Q, 1), lambda c, i: (0, 0)),                # q
                    pl.BlockSpec((Q, 1), lambda c, i: (0, 0)),                # q - 1
                ],
                out_specs=pl.BlockSpec((1, 8, 128), lambda c, i: (c, 0, 0)),
                scratch_shapes=[pltpu.VMEM((Q, tile_b), jnp.float32)],
            ),
            compiler_params=pltpu.CompilerParams(
                dimension_semantics=("parallel", "arbitrary")),
            cost_estimate=cost,
        )(actual_t, fc_t, self._q_pos, self._q_neg)

        # Per-core partials live in lane 0 of each core's row; combine cheaply.
        return jnp.sum(out[:, 0, 0])

    # Pure-JAX reference (mirrors the torch forward exactly) for checking.
    def reference(self, labels, fc_SI_quant):
        actual = labels[0] if isinstance(labels, (tuple, list)) else labels
        if actual.ndim == 1:
            actual = actual[:, None]
        d = actual.astype(jnp.float32) - fc_SI_quant.astype(jnp.float32)
        q = jnp.asarray(self.list_quantiles, dtype=jnp.float32)[None, :]
        mask_pos = d >= 0
        diff_pos = jnp.where(mask_pos, d, 0.0)
        diff_neg = jnp.where(mask_pos, 0.0, d)
        return jnp.sum(diff_pos * q - diff_neg * (1.0 - q))


if __name__ == "__main__":
    key = jax.random.PRNGKey(0)
    k_a, k_f = jax.random.split(key)

    batch = 300                                   # not a tile multiple -> masking path
    list_quantiles = [0.1, 0.25, 0.5, 0.75, 0.9]
    n_q = len(list_quantiles)

    actual_SI = jax.random.normal(k_a, (batch, 1), dtype=jnp.float32)
    fc_SI_quant = jax.random.normal(k_f, (batch, n_q), dtype=jnp.float32)

    loss_fn = LossPinballPallas(list_quantiles, dev=None)
    ref = loss_fn.reference((actual_SI,), fc_SI_quant)

    # tile_b=128 -> 3 batch blocks, 2-way core split, clamped overflow block +
    # ragged-tail masking: exercises init / accumulate / finalize / mask paths.
    loss = loss_fn((actual_SI,), fc_SI_quant, tile_b=128)
    loss = jax.block_until_ready(loss)
    assert loss.shape == ()
    assert jnp.allclose(loss, ref, rtol=1e-4, atol=1e-3), (loss, ref)

    # Production-default tile (single block, single core): also must match.
    loss2 = jax.block_until_ready(loss_fn((actual_SI,), fc_SI_quant))
    assert jnp.allclose(loss2, ref, rtol=1e-4, atol=1e-3), (loss2, ref)

    print("KERNEL_OK")
</pallas_src>

<mosaic_0001>
module attributes {stable_mosaic.version = 11 : i64} {
  func.func @_pinball_kernel(%arg0: i32, %arg1: i32, %arg2: memref<1x128xf32, #tpu.memory_space<vmem>>, %arg3: memref<5x128xf32, #tpu.memory_space<vmem>>, %arg4: memref<5x1xf32, #tpu.memory_space<vmem>>, %arg5: memref<5x1xf32, #tpu.memory_space<vmem>>, %arg6: memref<1x8x128xf32, #tpu.memory_space<vmem>>, %arg7: memref<5x128xf32, #tpu.memory_space<vmem>>) attributes {dimension_semantics = [#tpu.dimension_semantics<parallel>, #tpu.dimension_semantics<arbitrary>], iteration_bounds = array<i64: 2, 2>, scalar_prefetch = 0 : i64, scratch_operands = 1 : i64, tpu.core_type = #tpu.core_type<tc>, window_params = [{transform_indices = @transform_0, window_bounds = array<i64: 1, 128>}, {transform_indices = @transform_1, window_bounds = array<i64: 5, 128>}, {pipeline_mode = #tpu.pipeline_mode<synchronous>, transform_indices = @transform_2, window_bounds = array<i64: 5, 1>}, {pipeline_mode = #tpu.pipeline_mode<synchronous>, transform_indices = @transform_3, window_bounds = array<i64: 5, 1>}, {transform_indices = @transform_4, window_bounds = array<i64: 1, 8, 128>}]} {
    %c0_i32 = arith.constant 0 : i32
    %0 = arith.cmpi eq, %arg1, %c0_i32 : i32
    %1 = arith.extui %0 : i1 to i32
    %c0_i32_0 = arith.constant 0 : i32
    %2 = arith.cmpi ne, %1, %c0_i32_0 : i32
    scf.if %2 {
      %cst_14 = arith.constant 0.000000e+00 : f32
      %33 = vector.broadcast %cst_14 : f32 to vector<5x128xf32>
      %c0_15 = arith.constant 0 : index
      %c0_16 = arith.constant 0 : index
      %34 = vector.load %arg7[%c0_15, %c0_16] : memref<5x128xf32, #tpu.memory_space<vmem>>, vector<5x128xf32>
      tpu.vector_store %arg7[%c0_15, %c0_16], %33 {strides = array<i32>} : memref<5x128xf32, #tpu.memory_space<vmem>>, vector<5x128xf32>,
    } else {
    }
    %c0 = arith.constant 0 : index
    %c0_1 = arith.constant 0 : index
    %3 = vector.load %arg2[%c0, %c0_1] : memref<1x128xf32, #tpu.memory_space<vmem>>, vector<1x128xf32>
    %c0_2 = arith.constant 0 : index
    %c0_3 = arith.constant 0 : index
    %4 = vector.load %arg3[%c0_2, %c0_3] : memref<5x128xf32, #tpu.memory_space<vmem>>, vector<5x128xf32>
    %5 = vector.broadcast %3 : vector<1x128xf32> to vector<5x128xf32>
    %6 = arith.subf %5, %4 : vector<5x128xf32>
    %cst = arith.constant 0.000000e+00 : f32
    %7 = vector.broadcast %cst : f32 to vector<5x128xf32>
    %8 = arith.cmpf oge, %6, %7 : vector<5x128xf32>
    %c0_4 = arith.constant 0 : index
    %c0_5 = arith.constant 0 : index
    %9 = vector.load %arg4[%c0_4, %c0_5] : memref<5x1xf32, #tpu.memory_space<vmem>>, vector<5x1xf32>
    %c0_6 = arith.constant 0 : index
    %c0_7 = arith.constant 0 : index
    %10 = vector.load %arg5[%c0_6, %c0_7] : memref<5x1xf32, #tpu.memory_space<vmem>>, vector<5x1xf32>
    %11 = vector.shape_cast %9 : vector<5x1xf32> to vector<5x1xf32>
    %12 = vector.broadcast %11 : vector<5x1xf32> to vector<5x128xf32>
    %13 = vector.shape_cast %10 : vector<5x1xf32> to vector<5x1xf32>
    %14 = vector.broadcast %13 : vector<5x1xf32> to vector<5x128xf32>
    %15 = arith.select %8, %12, %14 : vector<5x128xi1>, vector<5x128xf32>
    %16 = arith.mulf %6, %15 : vector<5x128xf32>
    %c2_i32 = arith.constant 2 : i32
    %17 = arith.muli %arg0, %c2_i32 : i32
    %18 = arith.addi %17, %arg1 : i32
    %c128_i32 = arith.constant 128 : i32
    %19 = arith.muli %18, %c128_i32 : i32
    %20 = tpu.iota {dimensions = array<i32: 1>} : vector<5x128xi32>
    %21 = vector.broadcast %19 : i32 to vector<5x128xi32>
    %22 = arith.addi %20, %21 : vector<5x128xi32>
    %c300_i32 = arith.constant 300 : i32
    %23 = vector.broadcast %c300_i32 : i32 to vector<5x128xi32>
    %24 = arith.cmpi slt, %22, %23 : vector<5x128xi32>
    %cst_8 = arith.constant 0.000000e+00 : f32
    %25 = vector.broadcast %cst_8 : f32 to vector<5x128xf32>
    %26 = arith.select %24, %16, %25 : vector<5x128xi1>, vector<5x128xf32>
    %c0_9 = arith.constant 0 : index
    %c0_10 = arith.constant 0 : index
    %27 = vector.load %arg7[%c0_9, %c0_10] : memref<5x128xf32, #tpu.memory_space<vmem>>, vector<5x128xf32>
    %28 = arith.addf %27, %26 : vector<5x128xf32>
    %c0_11 = arith.constant 0 : index
    %c0_12 = arith.constant 0 : index
    %29 = vector.load %arg7[%c0_11, %c0_12] : memref<5x128xf32, #tpu.memory_space<vmem>>, vector<5x128xf32>
    tpu.vector_store %arg7[%c0_11, %c0_12], %28 {strides = array<i32>} : memref<5x128xf32, #tpu.memory_space<vmem>>, vector<5x128xf32>,
    %c1_i32 = arith.constant 1 : i32
    %30 = arith.cmpi eq, %arg1, %c1_i32 : i32
    %31 = arith.extui %30 : i1 to i32
    %c0_i32_13 = arith.constant 0 : i32
    %32 = arith.cmpi ne, %31, %c0_i32_13 : i32
    scf.if %32 {
      %c0_14 = arith.constant 0 : index
      %c0_15 = arith.constant 0 : index
      %33 = vector.load %arg7[%c0_14, %c0_15] : memref<5x128xf32, #tpu.memory_space<vmem>>, vector<5x128xf32>
      %34 = vector.shape_cast %33 : vector<5x128xf32> to vector<1x5x128xf32>
      %cst_16 = arith.constant dense<0.000000e+00> : vector<1xf32>
      %35 = vector.multi_reduction <add>, %34, %cst_16 [1, 2] : vector<1x5x128xf32> to vector<1xf32>
      %36 = vector.shape_cast %35 : vector<1xf32> to vector<1x1x1xf32>
      %37 = vector.extract %36[0, 0, 0] : f32 from vector<1x1x1xf32>
      %38 = vector.broadcast %37 : f32 to vector<1x8x128xf32>
      %c0_17 = arith.constant 0 : index
      %c0_18 = arith.constant 0 : index
      %c0_19 = arith.constant 0 : index
      %39 = vector.load %arg6[%c0_17, %c0_18, %c0_19] : memref<1x8x128xf32, #tpu.memory_space<vmem>>, vector<1x8x128xf32>
      tpu.vector_store %arg6[%c0_17, %c0_18, %c0_19], %38 {strides = array<i32>} : memref<1x8x128xf32, #tpu.memory_space<vmem>>, vector<1x8x128xf32>,
    } else {
    }
    return
  }
  func.func @transform_0(%arg0: i32, %arg1: i32) -> (i32, i32) {
    %c2_i32 = arith.constant 2 : i32
    %0 = arith.muli %arg0, %c2_i32 : i32
    %1 = arith.addi %0, %arg1 : i32
    %c2_i32_0 = arith.constant 2 : i32
    %2 = arith.minsi %1, %c2_i32_0 : i32
    %c0_i32 = arith.constant 0 : i32
    %c0_i32_1 = arith.constant 0 : i32
    return %c0_i32, %2 : i32, i32
  }
  func.func @transform_1(%arg0: i32, %arg1: i32) -> (i32, i32) {
    %c2_i32 = arith.constant 2 : i32
    %0 = arith.muli %arg0, %c2_i32 : i32
    %1 = arith.addi %0, %arg1 : i32
    %c2_i32_0 = arith.constant 2 : i32
    %2 = arith.minsi %1, %c2_i32_0 : i32
    %c0_i32 = arith.constant 0 : i32
    %c0_i32_1 = arith.constant 0 : i32
    return %c0_i32, %2 : i32, i32
  }
  func.func @transform_2(%arg0: i32, %arg1: i32) -> (i32, i32) {
    %c0_i32 = arith.constant 0 : i32
    %c0_i32_0 = arith.constant 0 : i32
    %c0_i32_1 = arith.constant 0 : i32
    return %c0_i32, %c0_i32_0 : i32, i32
  }
  func.func @transform_3(%arg0: i32, %arg1: i32) -> (i32, i32) {
    %c0_i32 = arith.constant 0 : i32
    %c0_i32_0 = arith.constant 0 : i32
    %c0_i32_1 = arith.constant 0 : i32
    return %c0_i32, %c0_i32_0 : i32, i32
  }
  func.func @transform_4(%arg0: i32, %arg1: i32) -> (i32, i32, i32) {
    %c0_i32 = arith.constant 0 : i32
    %c0_i32_0 = arith.constant 0 : i32
    %c0_i32_1 = arith.constant 0 : i32
    return %arg0, %c0_i32, %c0_i32_0 : i32, i32, i32
  }
}

</mosaic_0001>

<bundles_post_ra>
// kernel: tpu_custom_call.1
= control target key start
LH: loop header
LB: loop body
LE: loop exit
PB: predicated region body
PF: predicated region fallthrough
CT: control target
= control target key end

     0   :  { %9 = vsyncpa [#allocation4], 0  ;;  %s1008_s0 = inlined_call_operand.vmem [shape: f32[1,300], index: 0, kind: input, shape index: {}]   ;;  %s1009_s1 = inlined_call_operand.hbm [shape: f32[5,300], index: 1, kind: input, shape index: {}]   ;;  %s1010_s2 = inlined_call_operand.vmem [shape: f32[5,1], index: 2, kind: input, shape index: {}]   ;;  %s1011_s3 = inlined_call_operand.vmem [shape: f32[5,1], index: 3, kind: input, shape index: {}]   ;;  %s1012_s4 = inlined_call_operand.hbm [shape: f32[2,8,128], index: 4, kind: output, shape index: {}]  }
   0x1   :  { %11 = vsyncpa [#allocation4 + $0x1], 0 }
   0x2   :  { %12 = vsyncpa [#allocation5], 0 }
   0x3   :  { %14 = vsyncpa [#allocation5 + $0x1], 0  ;;  %s763_s15 = smov 0   ;;  %s765_s16 = smov 0  }
   0x4   :  { %s767_s17 = smov 0   ;;  %s769_s18 = smov 0  }
   0x5   :  { %s771_s19 = smov 0   ;;  %s773_s20 = smov 0  }
   0x6   :  { %s775_s21 = smov 0   ;;  %s777_s22 = smov 0  }
   0x7   :  { %s779_s23 = smov 0   ;;  %s781_s24 = smov 0  }
   0x8   :  { %s783_s25 = smov 0  }
   0x9 LB: > { %s446_s26 = sadd.s32 4294967295, %s732_s25   ;;  %s447_s27 = sadd.s32 4294967294, %s732_s25   ;;  %s732_s25 = sphi %s783_s25, %s20_s25   ;;  %s728_s24 = sphi %s781_s24, %s1041_s24   ;;  %s724_s23 = sphi %s779_s23, %s1040_s23   ;;  %s720_s22 = sphi %s777_s22, %s1039_s22   ;;  %s716_s21 = sphi %s775_s21, %s1038_s21   ;;  %s712_s20 = sphi %s773_s20, %s1037_s20   ;;  %s708_s19 = sphi %s771_s19, %s1036_s19   ;;  %s704_s18 = sphi %s769_s18, %s1035_s18   ;;  %s700_s17 = sphi %s767_s17, %s1034_s17   ;;  %s696_s16 = sphi %s765_s16, %s1033_s16   ;;  %s692_s15 = sphi %s763_s15, %s1032_s15  }
   0xa   : > { %s29_s28 = sadd.s32 1, %s724_s23  ;;  %s32_s29 = sadd.s32 1, %s728_s24 }
   0xb   : > { %p30_p0 = scmp.ge.s32.totalorder %s29_s28, 2  ;;  %s450_s30 = sshll.u32 %s728_s24, 1 }
   0xc   : > { %s71_s5 = sadd.s32 %s724_s23, %s450_s30  ;;  %s81_s6 = sadd.s32 1, %s712_s20 }
   0xd   : > { %s1043_s28 = smov (%p30_p0, %s29_s28), 0  ;;  %s1045_s29 = smov (!%p30_p0, %s32_s29), %s728_s24 }
   0xe   : > { %1017 = sst [smem:[#allocation9_spill]] %s1043_s28  ;;  %p72_p1 = scmp.lt.s32.totalorder %s71_s5, 2 }
   0xf   : > { %p88_p2 = scmp.ne.s32.totalorder %s712_s20, %s708_s19  ;;  %p34_p3 = scmp.ge.s32.totalorder %s1045_s29, 2 }
  0x10   : > { %p89_p4 = scmp.eq.s32.totalorder %s732_s25, 0  ;;  %s1047_s5 = smov (!%p72_p1, %s71_s5), 2 }
  0x11   : > { %s1049_s29 = smov (%p34_p3, %s1045_s29), 0  ;;  %p94_p6 = scmp.ne.s32.totalorder %s708_s19, %s704_s18 }
  0x12   : > { %1018 = sst [smem:[#allocation10_spill]] %s1049_s29  ;;  %p833_p5 = por %p89_p4, %p88_p2 }
  0x13   : > { %s451_s8 = sshll.u32 %s1049_s29, 1  ;;  %p95_p7 = scmp.eq.s32.totalorder %s446_s26, 0 }
  0x14   : > { %s75_s9 = sadd.s32 %s451_s8, %s1043_s28  ;;  %s146_s10 = ssub.s32 %s728_s24, %s1049_s29 }
  0x15   : > { %p76_p8 = scmp.lt.s32.totalorder %s75_s9, 2  ;;  %p845_p9 = por %p95_p7, %p94_p6 }
  0x16   : > { %p147_p10 = scmp.eq.s32.totalorder %s146_s10, 0  ;;  %s149_s12 = sadd.s32 1, %s700_s17 }
  0x17   : > { %s1051_s9 = smov (!%p76_p8, %s75_s9), 2  ;;  %p159_p11 = scmp.ne.s32.totalorder %s700_s17, %s696_s16 }
  0x18   : > { %s851_s13 = scalar_select %p147_p10, %s700_s17, %s149_s12  }
  0x19   : > { %s78_s14 = ssub.s32 %s1047_s5, %s1051_s9  ;;  %p160_p13 = scmp.eq.s32.totalorder %s446_s26, 3 }
  0x1a   : > { %p79_p12 = scmp.eq.s32.totalorder %s78_s14, 0  ;;  %p165_p0 = scmp.ne.s32.totalorder %s696_s16, %s692_s15 }
  0x1b   : > { %p166_p1 = scmp.eq.s32.totalorder %s447_s27, 3  ;;  %p864_p2 = por %p160_p13, %p159_p11 }
  0x1c   : > { %s862_s18 = scalar_select %p79_p12, %s712_s20, %s81_s6  }
  0x1d   : > { %s1021_s30 = scalar_select %p864_p2, 1, 0 }
  0x1e   : > { %p868_p3 = por %p166_p1, %p165_p0  ;;  %p487_p4 = scmp.lt.s32.totalorder %s732_s25, 4 }
  0x1f   : > { %s206_s9 = sand.u32 1, %s712_s20   ;;  %s456_s10 = sshll.u32 %s1047_s5, 7 }
  0x20   : > { %s1022_s8 = scalar_select %p868_p3, 1, 0 }
  0x21   : > { %s454_s12 = sshll.u32 %s206_s9, 3  ;;  %s877_s29 = scalar_lea.hbm %s1009_s1, %s456_s10 }
  0x22   : > { %s210_s27 = scalar_lea.vmem [#allocation3], %s454_s12  ;;  %p881_p6 = pnand %p487_p4, %p833_p5 }
  0x23   : > { %s221_s6 = sshll.u32 %s210_s27, 4  ;;  %s207_s5 = scalar_lea.sflag [#allocation4], %s206_s9  ;;  %s885_s6 = int_to_ptr.vmem [resolvable:$true] %s221_s6 }
  0x24   : > { %s580_s10 = scalar_lea.hbm %s877_s29, 128  ;;  %p582_p11 = pneg %p881_p6 }
  0x25   : > { %p581_p10 = scmp.ne.s32.totalorder %s877_s29, %s580_s10  ;;  %s585_s14 = scalar_lea.hbm %s1009_s1, 384 }
  0x26   : > { %p586_p5 = scmp.lt.u32.totalorder %s877_s29, %s1009_s1  ;;  %p587_p0 = scmp.lt.u32.totalorder %s585_s14, %s580_s10 }
  0x27   : > { %p583_p12 = pnand %p582_p11, %p581_p10  ;;  %p589_p4 = scmp.lt.u32.totalorder %s580_s10, %s877_s29 }
  0x28   : > { %p588_p1 = por %p587_p0, %p586_p5 }
  0x29   : > { %p584_p13 = pneg %p583_p12 }
  0x2a   : > { %p590_p7 = por %p589_p4, %p588_p1 }
  0x2c   : > { %p591_p8 = pnand %p590_p7, %p584_p13 }
  0x2e   : > { %594 = shalt.err (!%p591_p8)
}
  0x2f   : > { %s595_s9 = scalar_lea.vmem %s885_s6, 128  ;;  %s734_s7 = smov [#allocation3]  }
  0x30   : > { %p596_p10 = scmp.ne.s32.totalorder %s885_s6, %s595_s9  ;;  %s600_s12 = sshll.u32 %s734_s7, 4  ;;  %s601_s12 = int_to_ptr.vmem [resolvable:$false] %s600_s12 }
  0x31   : > { %s602_s26 = scalar_lea.vmem %s601_s12, 256  ;;  %p603_p2 = scmp.lt.s32.totalorder %s885_s6, %s601_s12 }
  0x32   : > { %p598_p12 = pnand %p596_p10, %p582_p11  ;;  %p604_p5 = scmp.lt.s32.totalorder %s602_s26, %s595_s9 }
  0x34   : > { %p599_p3 = pneg %p598_p12  ;;  %p605_p0 = por %p604_p5, %p603_p2 }
  0x36   : > { %p606_p1 = pnand %p605_p0, %p599_p3 }
  0x38   : > { %609 = shalt.err (!%p606_p1)
}
  0x39   : > { %482 = dma.hbm_to_vmem [thread:$0]  (!%p881_p6), %s877_s29, 128, %s885_s6, %s207_s5  }
  0x3a   : > { %p1024_p7 = scmp.lt.s32.totalorder %s732_s25, 5  ;;  %p1025_p8 = scmp.ge.s32.totalorder %s732_s25, 1 }
  0x3c   : > { %p227_p11 = pnand %p1025_p8, %p1024_p7 }
  0x3d   : > { %s232_s10 = sand.u32 (!%p227_p11), 1, %s708_s19  }
  0x3e   : > { %230 = sbr.rel (%p227_p11) target bundleno = 463 (0x1cf), region = 36  ;;  %s458_s14 = sshll.u32 (!%p227_p11), %s232_s10, 3 }
  0x3f   : > { %s233_s27 = scalar_lea.sflag (!%p227_p11), [#allocation4], %s232_s10  ;;  %s236_s9 = scalar_lea.vmem (!%p227_p11), [#allocation3], %s458_s14 }
  0x45   : > { %683 = dma.done.wait (%p845_p9), %s233_s27, 128  }
  0x46   : > { %685 = vsyncadd (%p845_p9), %s233_s27, 4294967168  ;;  %s1016_s28 = sand.u32 1, %s696_s16   ;;  %s460_s29 = sshll.u32 %s720_s22, 1 }
  0x47   : > { %s927_s6 = sshll.u32 %s1016_s28, 3  ;;  %s269_s5 = sadd.s32 %s716_s21, %s460_s29 }
  0x48   : > { %p270_p2 = scmp.lt.s32.totalorder %s269_s5, 2  ;;  %s267_s11 = scalar_lea.vmem [#allocation6], %s927_s6 }
  0x49   : > { %p464_p9 = scmp.ne.s32.totalorder %s716_s21, 0 }
  0x4a   : > { %s271_s7 = scalar_select %p270_p2, %s269_s5, 2 }
  0x4b   : > { %286 = sbr.rel (%p464_p9) target bundleno = 82 (0x52), region = 44  ;;  %v735_v0 = vmov (!%p464_p9), 0.0  }
  0x4c   : > { %s1053_s7 = smov (!%p270_p2, %s271_s7), 2  ;;  %287 = vst [vmem:[#allocation2] sm:$0x1f] (!%p464_p9), %v735_v0 }
  0x4d   : > { %s274_s10 = scalar_lea.vmem %s1008_s0, %s1053_s7 }
  0x52 PF: > { %v298_v1 = vld [vmem:[%s1010_s2] sm:$0x1f]  ;;  %v736_v2 = vmov 0   ;;  %v315_v4 = vlaneseq  ;;  %s467_s7 = sshll.u32 %s269_s5, 7  ;;  %v289_v6 = vld [vmem:[%s236_s9] sm:$0x1f] }
  0x53   : > { %579 = vset.pattern.permute.xlu0 %v736_v2  ;;  %v299_v3 = vld [vmem:[%s1011_s3] sm:$0x1f]  ;;  %v317_v8 = vstv %s467_s7  ;;  %p468_p3 = scmp.ne.s32.totalorder %s716_s21, 1 }
  0x54   : > { %302 = vperm.xlu0 %579, %v298_v1   ;;  %v465_v5 = vld [vmem:[%s274_s10] ss:$0 sm:$0xff]  ;;  %v316_v7 = vand.u32 127, %v315_v4  ;;  %vm329_vm2 = vcmask (!%p468_p3), 1044480  }
  0x55   : > { %v296_v9 = vsub.f32 %v465_v5, %v289_v6  ;;  %v321_v14 = vld [vmem:[#allocation2] sm:$0x1f] }
  0x56   : > { %v318_v11 = vadd.s32 %v317_v8, %v316_v7 }
  0x57   : > { %vm297_vm0 = vcmp.ge.f32.partialorder %v296_v9, 0.0 }
  0x58   : > { %307 = vperm.xlu0 %579, %v299_v3   ;;  %vm319_vm1 = vcmp.lt.s32.totalorder %v318_v11, 300 }
  0xd3   : > { %v303_v10 = vpop.permute.xlu0 %302 }
  0xd7   : > { %v308_v12 = vpop.permute.xlu0 %307 }
  0xd8   : > { %v310_v13 = vsel %vm297_vm0, %v303_v10, %v308_v12  ;;  %327 = sbr.rel (%p468_p3) target bundleno = 437 (0x1b5), region = 48 }
  0xd9   : > { %v311_v15 = vmul.f32 %v310_v13, %v296_v9 }
  0xdb   : > { %v320_v16 = vsel %vm319_vm1, %v311_v15, 0.0 }
  0xdc   : > { %v322_v17 = vadd.f32 %v321_v14, %v320_v16 }
  0xde   : > { %323 = vst [vmem:[#allocation2] sm:$0x1f] %v322_v17 }
  0xe5   : > { %v328_v18 = vld [vmem:[#allocation2] sm:$0x1f] }
  0xe6   : > { %v330_v19 = vsel %vm329_vm2, %v328_v18, 0.0 }
  0xe7   : > { %331 = vadd.xlane.f32.xlu0 %v330_v19 }
 0x174   : > { %v332_v20 = vpop.xlane.xlu0 %331 }
 0x175   : > { %v333_v21 = vrot.slane %v332_v20, 4 }
 0x177   : > { %v334_v22 = vadd.f32 %v333_v21, %v332_v20 }
 0x179   : > { %v335_v23 = vrot.slane %v334_v22, 2 }
 0x17b   : > { %v336_v24 = vadd.f32 %v335_v23, %v334_v22 }
 0x17d   : > { %v337_v25 = vrot.slane %v336_v24, 1 }
 0x17f   : > { %v338_v26 = vadd.f32 %v337_v25, %v336_v24 }
 0x181   : > { %473 = vpush %v338_v26 }
 0x1b2   : > { %s474_s9 = spop %473 }
 0x1b3   : > { %v340_v27 = vstv %s474_s9 }
 0x1b4   : > { %341 = vst [vmem:[%s267_s11] sm:$0xff] %v340_v27 }
 0x1b5 PF: > { %s470_s21 = sshll.u32 %s720_s22, 7  ;;  %s356_s26 = sshll.u32 %s267_s11, 4  ;;  %s357_s26 = int_to_ptr.vmem [resolvable:$true] %s356_s26 }
 0x1b6   : > { %s948_s12 = scalar_lea.hbm %s1012_s4, %s470_s21  ;;  %s1026_s10 = sand.u32 1, %s696_s16  }
 0x1b7   : > { %s343_s14 = scalar_lea.sflag [#allocation5], %s1026_s10  ;;  %s610_s27 = scalar_lea.vmem %s357_s26, 128 }
 0x1b8   : > { %p611_p6 = scmp.ne.s32.totalorder %s357_s26, %s610_s27  ;;  %p1027_p13 = scmp.ne.s32.totalorder %s1021_s30, 0 }
 0x1b9   : > { %s737_s29 = smov [#allocation6]  }
 0x1ba   : > { %p612_p4 = pnand %p611_p6, %p1027_p13  ;;  %s614_s7 = sshll.u32 %s737_s29, 4  ;;  %s615_s7 = int_to_ptr.vmem [resolvable:$false] %s614_s7 }
 0x1bb   : > { %s616_s9 = scalar_lea.vmem %s615_s7, 256  ;;  %p617_p12 = scmp.lt.s32.totalorder %s357_s26, %s615_s7 }
 0x1bc   : > { %p613_p10 = pneg %p612_p4  ;;  %p618_p5 = scmp.lt.s32.totalorder %s616_s9, %s610_s27 }
 0x1be   : > { %p619_p0 = por %p618_p5, %p617_p12 }
 0x1c0   : > { %p620_p1 = pnand %p619_p0, %p613_p10 }
 0x1c2   : > { %623 = shalt.err (!%p620_p1)
}
 0x1c3   : > { %s624_s22 = scalar_lea.hbm %s948_s12, 128  ;;  %s628_s21 = scalar_lea.hbm %s1012_s4, 256 }
 0x1c4   : > { %p625_p7 = scmp.ne.s32.totalorder %s948_s12, %s624_s22  ;;  %p629_p2 = scmp.lt.u32.totalorder %s948_s12, %s1012_s4 }
 0x1c5   : > { %p630_p9 = scmp.lt.u32.totalorder %s628_s21, %s624_s22  ;;  %p632_p6 = scmp.lt.u32.totalorder %s624_s22, %s948_s12 }
 0x1c6   : > { %p626_p8 = pnand %p625_p7, %p1027_p13 }
 0x1c7   : > { %p631_p3 = por %p630_p9, %p629_p2 }
 0x1c8   : > { %p627_p11 = pneg %p626_p8 }
 0x1c9   : > { %p633_p4 = por %p632_p6, %p631_p3 }
 0x1cb   : > { %p634_p10 = pnand %p633_p4, %p627_p11 }
 0x1cd   : > { %637 = shalt.err (!%p634_p10)
}
 0x1ce   : > { %477 = dma.vmem_to_hbm [thread:$0]  (%p1027_p13), %s357_s26, 128, %s948_s12, %s343_s14  }
 0x1cf PF: > { %p488_p12 = scmp.ge.s32.totalorder %s732_s25, 2  ;;  %s368_s10 = sand.u32 1, %s692_s15  }
 0x1d0   : > { %p1028_p5 = scmp.ne.s32.totalorder %s1022_s8, 0  ;;  %s369_s27 = scalar_lea.sflag [#allocation5], %s368_s10 }
 0x1d2   : > { %p484_p0 = pnand %p488_p12, %p1028_p5 }
 0x1d4   : > { %687 = dma.done.wait (!%p484_p0), %s369_s27, 128  }
 0x1d5   : > { %689 = vsyncadd (!%p484_p0), %s369_s27, 4294967168  ;;  %s20_s25 = sadd.s32 1, %s732_s25   ;;  %s1029_s30 = smov %s862_s18 }
 0x1d6   : > { %p17_p1 = scmp.ge.s32.totalorder %s20_s25, 6   ;;  %s1030_s12 = sld [smem:[#allocation9_spill]] }
 0x1d7   : > { %s1031_s26 = sld [smem:[#allocation10_spill]]  ;;  %s1032_s15 = smov %s696_s16 }
 0x1d8   : > { %s1033_s16 = smov %s700_s17  ;;  %s1034_s17 = smov %s851_s13 }
 0x1d9   : > { %s1035_s18 = smov %s708_s19  ;;  %s1036_s19 = smov %s712_s20 }
 0x1da   : > { %s1037_s20 = smov %s1029_s30  ;;  %s1038_s21 = smov %s724_s23 }
 0x1db   : > { %s1039_s22 = smov %s728_s24  ;;  %19 = sbr.rel (!%p17_p1) target bundleno = 9 (0x9), region = 92 }
 0x1dc   : > { %s1040_s23 = smov %s1030_s12 }
 0x1dd   : > { %s1041_s24 = smov %s1031_s26 }
 0x1e2   :  { %374 = vsyncpa [#allocation4], 1 }
 0x1e3   :  { %376 = vsyncpa [#allocation4 + $0x1], 1 }
 0x1e4   :  { %377 = vsyncpa [#allocation5], 1 }
 0x1e5   :  { %379 = vsyncpa [#allocation5 + $0x1], 1 }

</bundles_post_ra>
